<compile_context>
chip_gen: v5e
topology: v5e:2x2
jax: 0.10.0
libtpu: 0.0.40
codegen_flags: <defaults>
</compile_context>

<pallas_src>
import jax
import jax.numpy as jnp
from jax.experimental import pallas as pl
from jax.experimental.pallas import tpu as pltpu


def _chomp_copy_kernel(x_ref, o_ref):
    # Pure tile copy. The chomp is expressed by the BlockSpec windows; lanes of
    # the final ragged tile past L_out are dropped by the masked output store.
    o_ref[...] = x_ref[...]


def _round_up(x: int, m: int) -> int:
    return (x + m - 1) // m * m


def chomp1d(x: jax.Array, chomp_size: int, *,
            target_block_bytes: int = 2 << 20,     # ~2 MiB per block
            max_lane_tile: int = 2048,
            vmem_limit_bytes: int = 32 << 20) -> jax.Array:
    """Pallas implementation of Chomp1d.forward: x[:, :, :-chomp_size]."""
    assert chomp_size > 0, "chomp_size must be positive (matches PyTorch slice)"
    n, c, l = x.shape
    l_out = l - chomp_size
    assert l_out > 0, "chomp_size must be smaller than the time dimension"

    itemsize = jnp.dtype(x.dtype).itemsize
    # Sublane packing: 8 rows for 4-byte dtypes, 16 for bf16, 32 for int8.
    # (itemsize > 4, e.g. f64, degenerates to 8 — fine on TPU.)
    packing = 8 * max(1, 4 // itemsize) if itemsize <= 4 else 8

    # Fold (N, C) -> one packed row axis. Free: (N, C, L) row-major is
    # contiguous in (N*C, L).
    r = n * c
    x2 = x.reshape(r, l)

    # Lane (time) tile: multiple of 128 (lane-dense stores; only the final
    # ragged tile uses a masked vst), capped.
    tl = min(_round_up(l_out, 128), max_lane_tile)
    tl = max(tl, 128)

    # Row (merged N*C) tile from the byte budget, rounded to the sublane
    # packing so blocks stay fully packed.
    tr = max(target_block_bytes // (tl * itemsize), packing)
    tr = (tr // packing) * packing
    if tr >= r:
        tr = r                       # full-dim block: always legal
    # v7x megacore: keep >=2 parallel grid steps when the shape allows it.
    if pl.cdiv(r, tr) * pl.cdiv(l_out, tl) == 1 and r >= 2 * packing:
        tr = _round_up(pl.cdiv(r, 2), packing)

    grid = (pl.cdiv(r, tr), pl.cdiv(l_out, tl))
    block_shape = (tr, tl)
    index_map = lambda ri, li: (ri, li)   # input and output share the window

    out2 = pl.pallas_call(
        _chomp_copy_kernel,
        out_shape=jax.ShapeDtypeStruct((r, l_out), x.dtype),
        grid_spec=pltpu.PrefetchScalarGridSpec(
            num_scalar_prefetch=0,
            grid=grid,
            in_specs=[pl.BlockSpec(block_shape, index_map)],
            out_specs=pl.BlockSpec(block_shape, index_map),
        ),
        compiler_params=pltpu.CompilerParams(
            dimension_semantics=("parallel", "parallel"),
            vmem_limit_bytes=vmem_limit_bytes,
        ),
        cost_estimate=pl.CostEstimate(
            flops=0,
            transcendentals=0,
            bytes_accessed=2 * r * l_out * itemsize,
        ),
    )(x2)

    return out2.reshape(n, c, l_out)


if __name__ == "__main__":
    key = jax.random.PRNGKey(0)

    # Test 1: small TCN-like activation (N, C, L) = (2, 4, 16), chomp 3.
    # Exercises the N*C fold with tiny C (fully packed 8-row sublane block).
    N, C, L = 2, 4, 16
    chomp_size = 3
    x = jax.random.normal(key, (N, C, L), dtype=jnp.float32)
    out = jax.block_until_ready(chomp1d(x, chomp_size))
    ref = x[:, :, :-chomp_size]
    assert out.shape == (N, C, L - chomp_size), f"bad shape {out.shape}"
    assert out.dtype == x.dtype
    assert jnp.array_equal(out, ref), "Pallas chomp mismatch vs reference slice"

    # Test 2: force a multi-tile grid (row tiles + ragged lane tile) by using a
    # tiny per-block byte budget.
    key2 = jax.random.PRNGKey(1)
    N2, C2, L2, chomp2 = 2, 16, 384, 5
    x2 = jax.random.normal(key2, (N2, C2, L2), dtype=jnp.float32)
    out2 = jax.block_until_ready(
        chomp1d(x2, chomp2, target_block_bytes=4096, max_lane_tile=128))
    ref2 = x2[:, :, :-chomp2]
    assert out2.shape == (N2, C2, L2 - chomp2)
    assert jnp.array_equal(out2, ref2), "Pallas chomp mismatch (tiled case)"

    # Test 3: bf16 (sublane packing = 16) with default block sizing; also
    # exercises the >=2-parallel-steps split for an otherwise (1,1) grid.
    key3 = jax.random.PRNGKey(2)
    N3, C3, L3, chomp3 = 1, 32, 300, 4
    x3 = jax.random.normal(key3, (N3, C3, L3), dtype=jnp.bfloat16)
    out3 = jax.block_until_ready(chomp1d(x3, chomp3))
    ref3 = x3[:, :, :-chomp3]
    assert out3.shape == (N3, C3, L3 - chomp3)
    assert out3.dtype == x3.dtype
    assert jnp.array_equal(out3, ref3), "Pallas chomp mismatch (bf16 case)"

    print("KERNEL_OK")
</pallas_src>

<mosaic_0001>
module attributes {stable_mosaic.version = 11 : i64} {
  func.func @_chomp_copy_kernel(%arg0: i32, %arg1: i32, %arg2: memref<8x128xf32, #tpu.memory_space<vmem>>, %arg3: memref<8x128xf32, #tpu.memory_space<vmem>>) attributes {dimension_semantics = [#tpu.dimension_semantics<parallel>, #tpu.dimension_semantics<parallel>], iteration_bounds = array<i64: 1, 1>, scalar_prefetch = 0 : i64, scratch_operands = 0 : i64, tpu.core_type = #tpu.core_type<tc>, window_params = [{transform_indices = @transform_0, window_bounds = array<i64: 8, 128>}, {transform_indices = @transform_1, window_bounds = array<i64: 8, 128>}]} {
    %c0 = arith.constant 0 : index
    %c0_0 = arith.constant 0 : index
    %0 = vector.load %arg2[%c0, %c0_0] : memref<8x128xf32, #tpu.memory_space<vmem>>, vector<8x128xf32>
    %c0_1 = arith.constant 0 : index
    %c0_2 = arith.constant 0 : index
    %1 = vector.load %arg3[%c0_1, %c0_2] : memref<8x128xf32, #tpu.memory_space<vmem>>, vector<8x128xf32>
    tpu.vector_store %arg3[%c0_1, %c0_2], %0 {strides = array<i32>} : memref<8x128xf32, #tpu.memory_space<vmem>>, vector<8x128xf32>,
    return
  }
  func.func @transform_0(%arg0: i32, %arg1: i32) -> (i32, i32) {
    %c0_i32 = arith.constant 0 : i32
    return %arg0, %arg1 : i32, i32
  }
  func.func @transform_1(%arg0: i32, %arg1: i32) -> (i32, i32) {
    %c0_i32 = arith.constant 0 : i32
    return %arg0, %arg1 : i32, i32
  }
}

</mosaic_0001>

<bundles_post_ra>
// kernel: tpu_custom_call.1
= control target key start
LH: loop header
LB: loop body
LE: loop exit
PB: predicated region body
PF: predicated region fallthrough
CT: control target
= control target key end

     0   :  { %6 = vsyncpa [#allocation3], 0  ;;  %s114_s0 = inlined_call_operand.hbm [shape: f32[8,16], index: 0, kind: input, shape index: {}]   ;;  %s115_s1 = inlined_call_operand.hbm [shape: f32[8,13], index: 1, kind: output, shape index: {}]  }
   0x1   :  { %7 = vsyncpa [#allocation4], 0  ;;  %s13_s8 = sshll.u32 %s114_s0, 4  ;;  %s96_s9 = smov [#allocation2]   ;;  %s14_s8 = int_to_ptr.hbm [resolvable:$true] %s13_s8 }
   0x2   :  { %s15_s10 = sshll.u32 %s96_s9, 4  ;;  %s16_s10 = int_to_ptr.vmem [resolvable:$true] %s15_s10 }
   0x3   :  { %18 = dma.hbm_to_vmem [thread:$0]  %s14_s8, 128, %s16_s10, [#allocation3]  }
   0x4   :  { %92 = dma.done.wait [#allocation3], 128  }
   0x5   :  { %93 = vsyncadd [#allocation3], 4294967168  ;;  %s97_s11 = smov [#allocation5]   ;;  %s32_s15 = sshll.u32 %s115_s1, 4  ;;  %v23_v0 = vld [vmem:[#allocation2] sm:$0xff]  ;;  %s33_s15 = int_to_ptr.hbm [resolvable:$true] %s32_s15 }
   0x6   :  { %s30_s12 = sshll.u32 %s97_s11, 4  ;;  %24 = vst [vmem:[#allocation5] sm:$0xff] %v23_v0  ;;  %s31_s12 = int_to_ptr.vmem [resolvable:$true] %s30_s12 }
   0x7   :  { %35 = dma.vmem_to_hbm [thread:$0]  %s31_s12, 128, %s33_s15, [#allocation4]  }
   0x8   :  { %94 = dma.done.wait [#allocation4], 128  }
   0x9   :  { %95 = vsyncadd [#allocation4], 4294967168 }
   0xa   :  { %40 = vsyncpa [#allocation3], 1 }
   0xb   :  { %41 = vsyncpa [#allocation4], 1 }

</bundles_post_ra>
